<compile_context>
chip_gen: v7x
topology: tpu7x:2x2x1
jax: 0.10.0
libtpu: 0.0.40
codegen_flags: <defaults>
</compile_context>

<pallas_src>
from functools import partial

import jax
import jax.numpy as jnp
from jax import lax
from jax.experimental import pallas as pl
from jax.experimental.pallas import tpu as pltpu

N = 100    # logical rows, matches nn.Parameter(torch.ones(100, 1))
PAD = 128  # lane-dense padding: one full vreg lane dimension


def _model_kernel(scalars_ref,   # SMEM (2,) i32 : [mode (1=training), seed]
                  param_ref,     # VMEM (1, PAD) f32 (param row, zero-padded)
                  xin_ref,       # VMEM (1, PAD) f32 (eval input row, zero-padded)
                  y_pred_ref,    # VMEM (1, PAD) i32  out
                  x_ref,         # VMEM (1, PAD) f32  out
                  loss_ref):     # SMEM (1,)     f32  out
    mode = scalars_ref[0]

    # Counter-based PRNG (lowbias32 finalizer), portable to TPU and interpret mode.
    lane_i = lax.broadcasted_iota(jnp.int32, (1, PAD), 1)
    seed_u = scalars_ref[1].astype(jnp.uint32)
    z = lane_i.astype(jnp.uint32) + seed_u * jnp.uint32(0x9E3779B9)
    z = (z ^ (z >> 16)) * jnp.uint32(0x7FEB352D)
    z = (z ^ (z >> 15)) * jnp.uint32(0x846CA68B)
    z = z ^ (z >> 16)

    # torch.randint(0, 2, x.shape): top bit (independent of the 23 mantissa bits).
    y_pred_ref[...] = (z >> 31).astype(jnp.int32)

    @pl.when(mode == 1)
    def _():
        # rand_like(param) in [0, 1) from the low 23 bits; x = param + u * 0.01
        u = (z & jnp.uint32(0x007FFFFF)).astype(jnp.int32).astype(jnp.float32) \
            * jnp.float32(1.0 / 8388608.0)
        x_ref[...] = param_ref[...] + u * jnp.float32(0.01)

    @pl.when(mode != 1)
    def _():
        x_ref[...] = xin_ref[...]

    # x.sum().abs() over the valid N lanes only (padding lanes masked out).
    x_valid = jnp.where(lane_i < N, x_ref[...], jnp.float32(0.0))
    loss_ref[0] = jnp.abs(jnp.sum(x_valid))


@partial(jax.jit, static_argnames=("training",))
def _forward_impl(param, x_in, seed, *, training):
    mode = jnp.asarray(1 if training else 0, jnp.int32)
    scalars = jnp.stack([mode, jnp.asarray(seed, jnp.int32)])

    param_row = jnp.zeros((1, PAD), jnp.float32).at[0, :N].set(
        jnp.asarray(param, jnp.float32).reshape(-1))
    xin_row = jnp.zeros((1, PAD), jnp.float32).at[0, :N].set(
        jnp.asarray(x_in, jnp.float32).reshape(-1))

    y_pred_row, x_row, loss = pl.pallas_call(
        _model_kernel,
        out_shape=(
            jax.ShapeDtypeStruct((1, PAD), jnp.int32),    # y_pred (lane-dense)
            jax.ShapeDtypeStruct((1, PAD), jnp.float32),  # x      (lane-dense)
            jax.ShapeDtypeStruct((1,), jnp.float32),      # |sum(x)|
        ),
        in_specs=[
            pl.BlockSpec(memory_space=pltpu.MemorySpace.SMEM),  # scalars
            pl.BlockSpec(memory_space=pltpu.MemorySpace.VMEM),  # param row
            pl.BlockSpec(memory_space=pltpu.MemorySpace.VMEM),  # x_in row
        ],
        out_specs=(
            pl.BlockSpec(memory_space=pltpu.MemorySpace.VMEM),
            pl.BlockSpec(memory_space=pltpu.MemorySpace.VMEM),
            pl.BlockSpec(memory_space=pltpu.MemorySpace.SMEM),
        ),
    )(scalars, param_row, xin_row)

    # Wrapper glue (fused under jit): slice valid lanes, restore (N, 1) column view.
    x = x_row[0, :N].reshape(N, 1)
    y_pred = y_pred_row[0, :N].reshape(N, 1)
    y_true = jnp.zeros((N, 1), jnp.float32)  # zeros_like(x): no kernel work needed
    return ({"y_pred": y_pred, "y_true": y_true}, loss[0])


def my_deterministic_model_forward(param, x_in, *, training=True, seed=0):
    """param: (N, 1) f32.  x_in: (N,) f32 (only consumed when training=False)."""
    assert jnp.shape(x_in)[0] == N, "x_in must have length 100"
    return _forward_impl(param, x_in, jnp.asarray(seed, jnp.int32), training=training)


if __name__ == "__main__":
    key = jax.random.PRNGKey(0)
    # Deterministic parameter init, exactly as in the module: ones(100, 1).
    param = jnp.ones((N, 1), jnp.float32)
    # Example input consistent with the eval-mode path x[:, None]: shape (100,)
    x_in = jax.random.normal(key, (N,), jnp.float32)

    # Default torch module state is training=True -> param + rand*0.01 path.
    outs_tr, loss_tr = my_deterministic_model_forward(param, x_in, training=True, seed=0)
    jax.block_until_ready((outs_tr, loss_tr))

    # Also exercise the eval-mode branch (x[:, None]).
    outs_ev, loss_ev = my_deterministic_model_forward(param, x_in, training=False, seed=0)
    jax.block_until_ready((outs_ev, loss_ev))

    # Light sanity checks of the semantics.
    assert outs_tr["y_pred"].shape == (N, 1) and outs_tr["y_true"].shape == (N, 1)
    assert float(jnp.max(jnp.abs(outs_tr["y_true"]))) == 0.0
    assert bool(jnp.all((outs_tr["y_pred"] == 0) | (outs_tr["y_pred"] == 1)))
    # training x = 1 + u*0.01 with u in [0,1): sum in [100, 101); abs is itself.
    assert 100.0 <= float(loss_tr) <= 101.0
    # eval loss = |sum(x_in)|
    assert abs(float(loss_ev) - abs(float(jnp.sum(x_in)))) < 1e-3

    print("KERNEL_OK")
</pallas_src>

<mosaic_0001>
module attributes {stable_mosaic.version = 11 : i64} {
  func.func @_model_kernel(%arg0: memref<2xi32, #tpu.memory_space<smem>>, %arg1: memref<1x128xf32, #tpu.memory_space<vmem>>, %arg2: memref<1x128xf32, #tpu.memory_space<vmem>>, %arg3: memref<1x128xi32, #tpu.memory_space<vmem>>, %arg4: memref<1x128xf32, #tpu.memory_space<vmem>>, %arg5: memref<1xf32, #tpu.memory_space<smem>>) attributes {dimension_semantics = [], scalar_prefetch = 0 : i64, scratch_operands = 0 : i64, tpu.core_type = #tpu.core_type<tc>} {
    %c0 = arith.constant 0 : index
    %0 = memref.load %arg0[%c0] : memref<2xi32, #tpu.memory_space<smem>>
    %1 = tpu.iota {dimensions = array<i32: 1>} : vector<1x128xi32>
    %c1 = arith.constant 1 : index
    %2 = memref.load %arg0[%c1] : memref<2xi32, #tpu.memory_space<smem>>
    %c-1640531527_i32 = arith.constant -1640531527 : i32
    %3 = arith.muli %2, %c-1640531527_i32 : i32
    %4 = vector.broadcast %3 : i32 to vector<1x128xi32>
    %5 = arith.addi %1, %4 : vector<1x128xi32>
    %c16_i32 = arith.constant 16 : i32
    %6 = vector.broadcast %c16_i32 : i32 to vector<1x128xi32>
    %7 = arith.shrui %5, %6 : vector<1x128xi32>
    %8 = arith.xori %5, %7 : vector<1x128xi32>
    %c2146121005_i32 = arith.constant 2146121005 : i32
    %9 = vector.broadcast %c2146121005_i32 : i32 to vector<1x128xi32>
    %10 = arith.muli %8, %9 : vector<1x128xi32>
    %c15_i32 = arith.constant 15 : i32
    %11 = vector.broadcast %c15_i32 : i32 to vector<1x128xi32>
    %12 = arith.shrui %10, %11 : vector<1x128xi32>
    %13 = arith.xori %10, %12 : vector<1x128xi32>
    %c-2073254261_i32 = arith.constant -2073254261 : i32
    %14 = vector.broadcast %c-2073254261_i32 : i32 to vector<1x128xi32>
    %15 = arith.muli %13, %14 : vector<1x128xi32>
    %c16_i32_0 = arith.constant 16 : i32
    %16 = vector.broadcast %c16_i32_0 : i32 to vector<1x128xi32>
    %17 = arith.shrui %15, %16 : vector<1x128xi32>
    %18 = arith.xori %15, %17 : vector<1x128xi32>
    %c31_i32 = arith.constant 31 : i32
    %19 = vector.broadcast %c31_i32 : i32 to vector<1x128xi32>
    %20 = arith.shrui %18, %19 : vector<1x128xi32>
    %c0_1 = arith.constant 0 : index
    %c0_2 = arith.constant 0 : index
    %21 = vector.load %arg3[%c0_1, %c0_2] : memref<1x128xi32, #tpu.memory_space<vmem>>, vector<1x128xi32>
    tpu.vector_store %arg3[%c0_1, %c0_2], %20 {strides = array<i32>} : memref<1x128xi32, #tpu.memory_space<vmem>>, vector<1x128xi32>,
    %c1_i32 = arith.constant 1 : i32
    %22 = arith.cmpi eq, %0, %c1_i32 : i32
    %23 = arith.extui %22 : i1 to i32
    %c0_i32 = arith.constant 0 : i32
    %24 = arith.cmpi ne, %23, %c0_i32 : i32
    scf.if %24 {
      %c8388607_i32 = arith.constant 8388607 : i32
      %39 = vector.broadcast %c8388607_i32 : i32 to vector<1x128xi32>
      %40 = arith.andi %18, %39 : vector<1x128xi32>
      %41 = arith.sitofp %40 : vector<1x128xi32> to vector<1x128xf32>
      %cst_9 = arith.constant 1.1920929E-7 : f32
      %42 = vector.broadcast %cst_9 : f32 to vector<1x128xf32>
      %43 = arith.mulf %41, %42 : vector<1x128xf32>
      %c0_10 = arith.constant 0 : index
      %c0_11 = arith.constant 0 : index
      %44 = vector.load %arg1[%c0_10, %c0_11] : memref<1x128xf32, #tpu.memory_space<vmem>>, vector<1x128xf32>
      %cst_12 = arith.constant 0.00999999977 : f32
      %45 = vector.broadcast %cst_12 : f32 to vector<1x128xf32>
      %46 = arith.mulf %43, %45 : vector<1x128xf32>
      %47 = arith.addf %44, %46 : vector<1x128xf32>
      %c0_13 = arith.constant 0 : index
      %c0_14 = arith.constant 0 : index
      %48 = vector.load %arg4[%c0_13, %c0_14] : memref<1x128xf32, #tpu.memory_space<vmem>>, vector<1x128xf32>
      tpu.vector_store %arg4[%c0_13, %c0_14], %47 {strides = array<i32>} : memref<1x128xf32, #tpu.memory_space<vmem>>, vector<1x128xf32>,
    } else {
    }
    %c1_i32_3 = arith.constant 1 : i32
    %25 = arith.cmpi ne, %0, %c1_i32_3 : i32
    %26 = arith.extui %25 : i1 to i32
    %c0_i32_4 = arith.constant 0 : i32
    %27 = arith.cmpi ne, %26, %c0_i32_4 : i32
    scf.if %27 {
      %c0_9 = arith.constant 0 : index
      %c0_10 = arith.constant 0 : index
      %39 = vector.load %arg2[%c0_9, %c0_10] : memref<1x128xf32, #tpu.memory_space<vmem>>, vector<1x128xf32>
      %c0_11 = arith.constant 0 : index
      %c0_12 = arith.constant 0 : index
      %40 = vector.load %arg4[%c0_11, %c0_12] : memref<1x128xf32, #tpu.memory_space<vmem>>, vector<1x128xf32>
      tpu.vector_store %arg4[%c0_11, %c0_12], %39 {strides = array<i32>} : memref<1x128xf32, #tpu.memory_space<vmem>>, vector<1x128xf32>,
    } else {
    }
    %c100_i32 = arith.constant 100 : i32
    %28 = vector.broadcast %c100_i32 : i32 to vector<1x128xi32>
    %29 = arith.cmpi slt, %1, %28 : vector<1x128xi32>
    %c0_5 = arith.constant 0 : index
    %c0_6 = arith.constant 0 : index
    %30 = vector.load %arg4[%c0_5, %c0_6] : memref<1x128xf32, #tpu.memory_space<vmem>>, vector<1x128xf32>
    %cst = arith.constant 0.000000e+00 : f32
    %31 = vector.broadcast %cst : f32 to vector<1x128xf32>
    %32 = arith.select %29, %30, %31 : vector<1x128xi1>, vector<1x128xf32>
    %33 = vector.shape_cast %32 : vector<1x128xf32> to vector<1x1x128xf32>
    %cst_7 = arith.constant dense<0.000000e+00> : vector<1xf32>
    %34 = vector.multi_reduction <add>, %33, %cst_7 [1, 2] : vector<1x1x128xf32> to vector<1xf32>
    %35 = vector.shape_cast %34 : vector<1xf32> to vector<1x1x1xf32>
    %36 = vector.extract %35[0, 0, 0] : f32 from vector<1x1x1xf32>
    %37 = math.absf %36 : f32
    %c0_8 = arith.constant 0 : index
    %38 = memref.load %arg5[%c0_8] : memref<1xf32, #tpu.memory_space<smem>>
    memref.store %37, %arg5[%c0_8] : memref<1xf32, #tpu.memory_space<smem>>
    return
  }
}

</mosaic_0001>

<bundles_post_ra>
// kernel: _forward_impl.1
= control target key start
LH: loop header
LB: loop body
LE: loop exit
PB: predicated region body
PF: predicated region fallthrough
CT: control target
= control target key end

     0   :  { %11 = vsyncpa [#allocation5], 0  ;;  %s242_s0 = inlined_call_operand.vmem [shape: s32[2], index: 0, kind: input, shape index: {}]   ;;  %s243_s1 = inlined_call_operand.vmem [shape: f32[1,128], index: 1, kind: input, shape index: {}]   ;;  %s244_s2 = inlined_call_operand.vmem [shape: f32[1,128], index: 2, kind: input, shape index: {}]   ;;  %s245_s3 = inlined_call_operand.vmem [shape: s32[1,128], index: 3, kind: output, shape index: {0}]   ;;  %s246_s4 = inlined_call_operand.hbm [shape: f32[1,128], index: 4, kind: output, shape index: {1}]   ;;  %s247_s5 = inlined_call_operand.hbm [shape: f32[1], index: 5, kind: output, shape index: {2}]  }
   0x1   :  { %12 = vsyncpa [#allocation3], 0 }
   0x2   :  { %13 = vsyncpa [#allocation4], 0  ;;  %s20_s20 = sshll.u32 %s242_s0, 4  ;;  %s21_s20 = int_to_ptr.vmem [resolvable:$true] %s20_s20 }
   0x3   :  { %s123_s21 = scalar_lea.vmem %s21_s20, 16  ;;  %p128_p1 = scmp.lt.s32.totalorder %s21_s20, %s21_s20 }
   0x4   :  { %p124_p0 = scmp.ne.s32.totalorder %s21_s20, %s123_s21  ;;  %p129_p2 = scmp.lt.s32.totalorder %s123_s21, %s123_s21 }
   0x6   :  { %p130_p3 = por %p129_p2, %p128_p1 }
   0x8   :  { %p131_p4 = pnand %p130_p3, %p124_p0 }
   0xa   :  { %134 = shalt.err (!%p131_p4)
}
   0xb   :  { %s173_s22 = smov [#allocation2]  }
   0xc   :  { %23 = dma.vmem_to_smem %s21_s20, 16, %s173_s22, [#allocation5]  }
   0xd   :  { %167 = dma.done.wait [#allocation5], 16  }
   0xe   :  { %168 = vsyncadd [#allocation5], 4294967280 }
   0xf   :  { %31 = sfence }
  0x10   :  { %s32_s23 = sld [smem:[#allocation2]]  ;;  %s115_s24 = sld [smem:[#allocation2 + $0x1]]  ;;  %v33_v0 = vlaneseq }
  0x12   :  { %v34_v1 = vand.u32 127, %v33_v0 }
  0x16   :  { %s36_s25 = smul.u32 2654435769, %s115_s24  ;;  %p116_p5 = scmp.ne.s32.totalorder %s32_s23, 1 }
  0x17   :  { %v56_v16 = vld [vmem:[%s243_s1] sm:$0x1] (!%p116_p5) }
  0x18   :  { %v37_v2 = vstv %s36_s25 }
  0x19   :  { %v38_v3 = vadd.s32 %v37_v2, %v34_v1 }
  0x1b   :  { %v39_v4 = vshrl.u32 %v38_v3, 16 }
  0x1d   :  { %v40_v5 = vxor.u32 %v39_v4, %v38_v3 }
  0x1f   :  { %v41_v6 = vmul.u32 2146121005, %v40_v5 }
  0x21   :  { %v42_v7 = vshrl.u32 %v41_v6, 15 }
  0x23   :  { %v43_v8 = vxor.u32 %v42_v7, %v41_v6 }
  0x25   :  { %v44_v9 = vmul.u32 2221713035, %v43_v8 }
  0x27   :  { %v45_v10 = vshrl.u32 %v44_v9, 16  ;;  %52 = sbr.rel (%p116_p5) target bundleno = 54 (0x36), region = 21 }
  0x29   :  { %v46_v11 = vxor.u32 %v45_v10, %v44_v9 }
  0x2b   :  { %v47_v12 = vshrl.u32 %v46_v11, 31  ;;  %v53_v13 = vand.u32 (!%p116_p5), 8388607, %v46_v11 }
  0x2d   :  { %48 = vst [vmem:[%s245_s3] sm:$0x1] %v47_v12  ;;  %v54_v14 = vcvt.s32.f32 (!%p116_p5), %v53_v13 }
  0x2f   :  { %v55_v15 = vmul.f32 1.1920929e-07, %v54_v14 }
  0x31   :  { %v57_v17 = vmul.f32 0.01, %v55_v15 }
  0x33   :  { %v58_v18 = vadd.f32 %v57_v17, %v56_v16 }
  0x35   :  { %59 = vst [vmem:[#allocation6] sm:$0x1] %v58_v18 }
  0x36 PF:  { %p117_p6 = scmp.eq.s32.totalorder %s32_s23, 1 }
  0x37   :  { %v64_v19 = vld [vmem:[%s244_s2] sm:$0x1] (!%p117_p6) }
  0x38   :  { %63 = sbr.rel (%p117_p6) target bundleno = 63 (0x3f), region = 25  ;;  %65 = vst [vmem:[#allocation6] sm:$0x1] (!%p117_p6), %v64_v19 }
  0x3f PF:  { %vm66_vm0 = vcmp.lt.s32.totalorder %v34_v1, 100  ;;  %v67_v20 = vld [vmem:[#allocation6] sm:$0x1]  ;;  %vm69_vm1 = vcmask 1040384   ;;  %s174_s3 = smov [#allocation6]  }
  0x40   :  { %v68_v21 = vsel %vm66_vm0, %v67_v20, 0.0  ;;  %s91_s1 = sshll.u32 %s174_s3, 4  ;;  %s92_s1 = int_to_ptr.vmem [resolvable:$true] %s91_s1 }
  0x41   :  { %v70_v22 = vsel %vm69_vm1, %v68_v21, 0.0  ;;  %s135_s6 = scalar_lea.vmem %s92_s1, 16  ;;  %s139_s7 = scalar_lea.vmem %s92_s1, 32 }
  0x42   :  { %71 = vadd.xlane.f32.xlu0 %v70_v22  ;;  %p136_p7 = scmp.ne.s32.totalorder %s92_s1, %s135_s6  ;;  %p140_p8 = scmp.lt.s32.totalorder %s92_s1, %s92_s1 }
  0x43   :  { %p141_p9 = scmp.lt.s32.totalorder %s139_s7, %s135_s6 }
  0x45   :  { %p142_p10 = por %p141_p9, %p140_p8 }
  0x47   :  { %p143_p11 = pnand %p142_p10, %p136_p7 }
  0x49   :  { %146 = shalt.err (!%p143_p11)
}
  0x4a   :  { %s147_s9 = scalar_lea.hbm %s246_s4, 16 }
  0x4b   :  { %p148_p12 = scmp.ne.s32.totalorder %s246_s4, %s147_s9  ;;  %p151_p13 = scmp.lt.u32.totalorder %s147_s9, %s246_s4 }
  0x4d   :  { %p153_p0 = pnand %p151_p13, %p148_p12 }
  0x4f   :  { %156 = shalt.err (!%p153_p0)
}
  0x50   :  { %94 = dma.vmem_to_hbm [thread:$0]  %s92_s1, 16, %s246_s4, [#allocation3]  }
  0x51   :  { %s157_s20 = scalar_lea.hbm %s247_s5, 16 }
  0x52   :  { %p158_p1 = scmp.ne.s32.totalorder %s247_s5, %s157_s20  ;;  %p161_p2 = scmp.lt.u32.totalorder %s157_s20, %s247_s5 }
  0x54   :  { %p163_p3 = pnand %p161_p2, %p158_p1 }
  0xcf   :  { %v72_v23 = vpop.xlane.xlu0 %71 }
  0xd0   :  { %v73_v24 = vrot.slane %v72_v23, 4 }
  0xd2   :  { %v74_v25 = vadd.f32 %v73_v24, %v72_v23 }
  0xd4   :  { %v75_v26 = vrot.slane %v74_v25, 2 }
  0xd6   :  { %v76_v27 = vadd.f32 %v75_v26, %v74_v25 }
  0xd8   :  { %v77_v28 = vrot.slane %v76_v27, 1 }
  0xda   :  { %v78_v29 = vadd.f32 %v77_v28, %v76_v27 }
  0xdc   :  { %118 = vpush %v78_v29 }
 0x10d   :  { %s119_s16 = spop %118 }
 0x10e   :  { %s80_s17 = sand.u32 2147483647, %s119_s16 }
 0x10f   :  { %82 = sst [smem:[#allocation7]] %s80_s17 }
 0x110   :  { %166 = shalt.err (!%p163_p3)
}
 0x111   :  { %s175_s24 = smov [#allocation7]  }
 0x112   :  { %102 = dma.smem_to_hbm %s175_s24, 16, %s247_s5, [#allocation4]  }
 0x113   :  { %169 = dma.done.wait [#allocation3], 16  }
 0x114   :  { %170 = vsyncadd [#allocation3], 4294967280 }
 0x115   :  { %171 = dma.done.wait [#allocation4], 16  }
 0x116   :  { %172 = vsyncadd [#allocation4], 4294967280 }
 0x117   :  { %111 = sfence }
 0x118   :  { %112 = vsyncpa [#allocation3], 1 }
 0x119   :  { %113 = vsyncpa [#allocation4], 1 }
 0x11a   :  { %114 = vsyncpa [#allocation5], 1 }

</bundles_post_ra>
